<compile_context>
chip_gen: v7x
topology: tpu7x:2x2x1
jax: 0.10.0
libtpu: 0.0.40
codegen_flags: <defaults>
</compile_context>

<pallas_src>
import jax
import jax.numpy as jnp
from jax.experimental import pallas as pl
from jax.experimental.pallas import tpu as pltpu


def _s_module_kernel(neg_lam_ref, x_ref, o_ref):
    # neg_lam_ref: (1,) f32 scalar in SMEM (already negated lambda).
    # x_ref / o_ref: (block_r, lane_w) VMEM tiles in the I/O dtype.
    neg_lam = neg_lam_ref[0]
    # TODO(synk): on v6e/v7x with bf16 I/O, computing exp in bf16 (skip this
    # upcast) halves vreg pressure; kept in f32 to match the f32 reference.
    x = x_ref[...].astype(jnp.float32)
    o_ref[...] = jnp.exp(x * neg_lam).astype(o_ref.dtype)


def _block_target_bytes() -> int:
    """Per-block byte target; generation-aware (bigger on v7x)."""
    try:
        kind = jax.devices()[0].device_kind.lower()
    except Exception:  # pragma: no cover - conservative fallback
        return 2 << 20
    if "v7" in kind:
        # v7x: ~3.2 TB/s HBM per TC -> amortize per-step overhead harder.
        # 4 MiB block -> 16 MiB double-buffered i/o, under the 32 MiB limit.
        return 4 << 20
    return 2 << 20  # v5e/v6e: 8 MiB total buffering, safe everywhere.


def s_module_forward(delta_s: jax.Array, lambda_s: jax.Array) -> jax.Array:
    """exp(-(delta_s * lambda_s)) computed in a Pallas TPU kernel.

    delta_s: any shape / float dtype (NCHW from the PyTorch module).
    lambda_s: scalar parameter, shape (1,).
    """
    orig_shape = delta_s.shape
    dtype = delta_s.dtype

    flat = delta_s.reshape(-1)  # native dtype, no wrapper cast
    n = flat.shape[0]

    neg_lam_f32 = (-lambda_s.astype(jnp.float32)).reshape((1,))

    # Lane-dense width (multiple of 128) that divides n exactly, if possible.
    lane_w = None
    for cand in (1024, 512, 256, 128):
        if n % cand == 0:
            lane_w = cand
            break

    if lane_w is not None:
        main, tail = flat, None
        n_main = n
    else:
        # Ragged: kernel on the largest 128-divisible prefix; < 128-element
        # tail handled in plain jnp (no full-array pad + slice round trip).
        lane_w = 128
        n_main = (n // lane_w) * lane_w
        main = flat[:n_main]
        tail = flat[n_main:]

    if n_main == 0:
        # Tiny (< 128 element) input: not worth a kernel launch.
        out_flat = jnp.exp(flat.astype(jnp.float32) * neg_lam_f32[0]).astype(dtype)
        return out_flat.reshape(orig_shape)

    rows = n_main // lane_w
    x2d = main.reshape(rows, lane_w)

    itemsize = jnp.dtype(dtype).itemsize
    # Native sublane tile: 8 rows for 4-byte, 16 for 2-byte, 32 for 1-byte.
    sublane_mult = {4: 8, 2: 16, 1: 32}.get(itemsize, 8)

    target_bytes = _block_target_bytes()
    block_r = max(
        sublane_mult,
        (target_bytes // (lane_w * itemsize)) // sublane_mult * sublane_mult,
    )
    total_bytes = rows * lane_w * itemsize
    if block_r >= rows:
        block_r = rows  # full extent is always a legal block
        # Mid-size arrays: keep >= 2 grid steps so v7x's two TensorCores both
        # get work via the "parallel" grid axis.
        if total_bytes > (512 << 10) and rows >= 2 * sublane_mult:
            half = pl.cdiv(rows, 2)
            block_r = ((half + sublane_mult - 1) // sublane_mult) * sublane_mult

    grid = (pl.cdiv(rows, block_r),)  # ragged last block masked by Pallas

    out2d = pl.pallas_call(
        _s_module_kernel,
        out_shape=jax.ShapeDtypeStruct((rows, lane_w), dtype),
        grid=grid,
        in_specs=[
            pl.BlockSpec(memory_space=pltpu.MemorySpace.SMEM),  # -lambda scalar
            pl.BlockSpec((block_r, lane_w), lambda i: (i, 0)),  # x block
        ],
        out_specs=pl.BlockSpec((block_r, lane_w), lambda i: (i, 0)),
        compiler_params=pltpu.CompilerParams(
            dimension_semantics=("parallel",),
            vmem_limit_bytes=32 * 1024 * 1024,  # headroom for the bigger blocks
        ),
    )(neg_lam_f32, x2d)

    out_flat = out2d.reshape(-1)
    if tail is not None and tail.shape[0] > 0:
        tail_out = jnp.exp(tail.astype(jnp.float32) * neg_lam_f32[0]).astype(dtype)
        out_flat = jnp.concatenate([out_flat, tail_out])
    return out_flat.reshape(orig_shape)


if __name__ == "__main__":
    key = jax.random.PRNGKey(0)

    # Deterministic parameter init, matching S_Module(beta) with beta != 0:
    #   self.lambda_s = nn.Parameter(torch.ones(1) * beta)
    beta = 0.5
    lambda_s = jnp.ones((1,), dtype=jnp.float32) * beta
    # TODO(synk): the beta == 0 branch uses torch.rand(1); would be
    # jax.random.uniform(key, (1,)) if that init path were needed.

    # Small NCHW input consistent with the conv-style callers of this module.
    x = jax.random.normal(key, (2, 4, 16, 16), dtype=jnp.float32)
    out = s_module_forward(x, lambda_s)
    out = jax.block_until_ready(out)

    ref = jnp.exp(-(x * lambda_s[0]))
    assert out.shape == x.shape
    assert out.dtype == x.dtype
    assert jnp.allclose(out, ref, atol=1e-6, rtol=1e-6)

    # Also exercise the ragged path (element count not divisible by 128).
    key2 = jax.random.PRNGKey(0)
    xr = jax.random.normal(key2, (3, 5, 7, 11), dtype=jnp.float32)
    out_r = jax.block_until_ready(s_module_forward(xr, lambda_s))
    ref_r = jnp.exp(-(xr * lambda_s[0]))
    assert out_r.shape == xr.shape
    assert out_r.dtype == xr.dtype
    assert jnp.allclose(out_r, ref_r, atol=1e-6, rtol=1e-6)

    print("KERNEL_OK")
</pallas_src>

<mosaic_0001>
module attributes {stable_mosaic.version = 11 : i64} {
  func.func @_s_module_kernel(%arg0: i32, %arg1: memref<1xf32, #tpu.memory_space<smem>>, %arg2: memref<2x1024xf32, #tpu.memory_space<vmem>>, %arg3: memref<2x1024xf32, #tpu.memory_space<vmem>>) attributes {dimension_semantics = [#tpu.dimension_semantics<parallel>], iteration_bounds = array<i64: 1>, scalar_prefetch = 0 : i64, scratch_operands = 0 : i64, tpu.core_type = #tpu.core_type<tc>, window_params = [{transform_indices = @transform_0, window_bounds = array<i64: 1>}, {transform_indices = @transform_1, window_bounds = array<i64: 2, 1024>}, {transform_indices = @transform_2, window_bounds = array<i64: 2, 1024>}]} {
    %c0 = arith.constant 0 : index
    %0 = memref.load %arg1[%c0] : memref<1xf32, #tpu.memory_space<smem>>
    %c0_0 = arith.constant 0 : index
    %c0_1 = arith.constant 0 : index
    %1 = vector.load %arg2[%c0_0, %c0_1] : memref<2x1024xf32, #tpu.memory_space<vmem>>, vector<2x1024xf32>
    %2 = vector.broadcast %0 : f32 to vector<2x1024xf32>
    %3 = arith.mulf %1, %2 : vector<2x1024xf32>
    %4 = math.exp %3 : vector<2x1024xf32>
    %c0_2 = arith.constant 0 : index
    %c0_3 = arith.constant 0 : index
    %5 = vector.load %arg3[%c0_2, %c0_3] : memref<2x1024xf32, #tpu.memory_space<vmem>>, vector<2x1024xf32>
    tpu.vector_store %arg3[%c0_2, %c0_3], %4 {strides = array<i32>} : memref<2x1024xf32, #tpu.memory_space<vmem>>, vector<2x1024xf32>,
    return
  }
  func.func @transform_0(%arg0: i32) -> i32 {
    %c0_i32 = arith.constant 0 : i32
    %c0_i32_0 = arith.constant 0 : i32
    return %c0_i32 : i32
  }
  func.func @transform_1(%arg0: i32) -> (i32, i32) {
    %c0_i32 = arith.constant 0 : i32
    %c0_i32_0 = arith.constant 0 : i32
    return %arg0, %c0_i32 : i32, i32
  }
  func.func @transform_2(%arg0: i32) -> (i32, i32) {
    %c0_i32 = arith.constant 0 : i32
    %c0_i32_0 = arith.constant 0 : i32
    return %arg0, %c0_i32 : i32, i32
  }
}

</mosaic_0001>

<bundles_post_ra>
// kernel: tpu_custom_call.1
= control target key start
LH: loop header
LB: loop body
LE: loop exit
PB: predicated region body
PF: predicated region fallthrough
CT: control target
= control target key end

     0   :  { %8 = vsyncpa [#allocation4], 0  ;;  %s150_s0 = inlined_call_operand.<no memory space> [shape: f32[1], index: 0, kind: input, shape index: {}]   ;;  %s151_s1 = inlined_call_operand.hbm [shape: f32[2,1024], index: 1, kind: input, shape index: {}]   ;;  %s152_s2 = inlined_call_operand.hbm [shape: f32[2,1024], index: 2, kind: output, shape index: {}]  }
   0x1   :  { %9 = vsyncpa [#allocation5], 0  ;;  %s106_s9 = smov [#allocation3]   ;;  %s58_s13 = scalar_lea.hbm %s151_s1, 256 }
   0x2   :  { %s18_s10 = sshll.u32 %s106_s9, 4  ;;  %p59_p0 = scmp.ne.s32.totalorder %s151_s1, %s58_s13  ;;  %s19_s10 = int_to_ptr.vmem [resolvable:$true] %s18_s10 }
   0x3   :  { %p62_p1 = scmp.lt.u32.totalorder %s58_s13, %s151_s1 }
   0x5   :  { %p64_p2 = pnand %p62_p1, %p59_p0 }
   0x7   :  { %67 = shalt.err (!%p64_p2)
}
   0x8   :  { %s68_s18 = scalar_lea.vmem %s19_s10, 256  ;;  %p73_p4 = scmp.lt.s32.totalorder %s19_s10, %s19_s10 }
   0x9   :  { %p69_p3 = scmp.ne.s32.totalorder %s19_s10, %s68_s18  ;;  %p74_p5 = scmp.lt.s32.totalorder %s68_s18, %s68_s18 }
   0xb   :  { %p75_p6 = por %p74_p5, %p73_p4 }
   0xd   :  { %p76_p7 = pnand %p75_p6, %p69_p3 }
   0xf   :  { %79 = shalt.err (!%p76_p7)
}
  0x10   :  { %21 = dma.hbm_to_vmem [thread:$0]  %s151_s1, 256, %s19_s10, [#allocation4]  }
  0x11   :  { %102 = dma.done.wait [#allocation4], 256  }
  0x12   :  { %103 = vsyncadd [#allocation4], 4294967040  ;;  %v28_v0 = vstv %s150_s0  ;;  %v26_v1 = vld [vmem:[#allocation3] sm:$0xff]  ;;  %v27_v2 = vld [vmem:[#allocation3 + $0x8] sm:$0xff]  ;;  %s107_s23 = smov [#allocation6]  }
  0x13   :  { %v29_v3 = vmul.f32 %v28_v0, %v26_v1  ;;  %v30_v4 = vmul.f32 %v28_v0, %v27_v2  ;;  %s43_s24 = sshll.u32 %s107_s23, 4  ;;  %s44_s24 = int_to_ptr.vmem [resolvable:$true] %s43_s24 }
  0x14   :  { %s80_s1 = scalar_lea.vmem %s44_s24, 256  ;;  %p85_p9 = scmp.lt.s32.totalorder %s44_s24, %s44_s24 }
  0x15   :  { %v31_v5 = vmul.f32 1.442695, %v29_v3  ;;  %v33_v6 = vmul.f32 1.442695, %v30_v4  ;;  %p81_p8 = scmp.ne.s32.totalorder %s44_s24, %s80_s1  ;;  %p86_p10 = scmp.lt.s32.totalorder %s80_s1, %s80_s1 }
  0x17   :  { %54 = vpow2.f32 %v31_v5  ;;  %p87_p11 = por %p86_p10, %p85_p9 }
  0x18   :  { %56 = vpow2.f32 %v33_v6 }
  0x19   :  { %p88_p12 = pnand %p87_p11, %p81_p8 }
  0x21   :  { %v55_v7 = vpop.eup %54 }
  0x22   :  { %v57_v8 = vpop.eup %56  ;;  %35 = vst [vmem:[#allocation6] sm:$0xff] %v55_v7 }
  0x23   :  { %36 = vst [vmem:[#allocation6 + $0x8] sm:$0xff] %v57_v8 }
  0x24   :  { %91 = shalt.err (!%p88_p12)
}
  0x25   :  { %s92_s26 = scalar_lea.hbm %s152_s2, 256 }
  0x26   :  { %p93_p13 = scmp.ne.s32.totalorder %s152_s2, %s92_s26  ;;  %p96_p0 = scmp.lt.u32.totalorder %s92_s26, %s152_s2 }
  0x28   :  { %p98_p1 = pnand %p96_p0, %p93_p13 }
  0x2a   :  { %101 = shalt.err (!%p98_p1)
}
  0x2b   :  { %46 = dma.vmem_to_hbm [thread:$0]  %s44_s24, 256, %s152_s2, [#allocation5]  }
  0x2c   :  { %104 = dma.done.wait [#allocation5], 256  }
  0x2d   :  { %105 = vsyncadd [#allocation5], 4294967040 }
  0x2e   :  { %50 = vsyncpa [#allocation4], 1 }
  0x2f   :  { %51 = vsyncpa [#allocation5], 1 }

</bundles_post_ra>
